<compile_context>
chip_gen: v7x
topology: tpu7x:2x2x1
jax: 0.10.0
libtpu: 0.0.40
codegen_flags: <defaults>
</compile_context>

<pallas_src>
import functools

import jax
import jax.numpy as jnp
from jax import lax
from jax.experimental import pallas as pl
from jax.experimental.pallas import tpu as pltpu


def _round_up(a: int, m: int) -> int:
    return (a + m - 1) // m * m


def mlp_kernel(x_ref, w1_ref, b1_ref, w2_ref, b2_ref, o_ref):
    # fc1: [TB, D] x [H_pad, D] contracted on D -> [TB, H_pad]  (PyTorch [out, in] layout kept)
    h = lax.dot_general(
        x_ref[...], w1_ref[...],
        dimension_numbers=(((1,), (1,)), ((), ())),
        preferred_element_type=jnp.float32,
    )
    h = jnp.maximum(h + b1_ref[...], 0.0)          # bias + ReLU on the VPU
    # fc2: [TB, H_pad] x [C_pad, H_pad] contracted on H -> [TB, C_pad]
    y = lax.dot_general(
        h, w2_ref[...],
        dimension_numbers=(((1,), (1,)), ((), ())),
        preferred_element_type=jnp.float32,
    )
    o_ref[...] = (y + b2_ref[...]).astype(o_ref.dtype)


def prepare_params(w1, b1, w2, b2):
    """One-time (outside the hot path) zero-padding of H and C up to lane-dense multiples of 128.

    w1: [H, D], b1: [H], w2: [C, H], b2: [C]  (PyTorch nn.Linear layout, no transpose needed).
    Padded rows of fc1 produce ReLU(0 + 0) = 0 and the matching padded columns of fc2 are zero,
    so padding does not change the valid [B, C] output.
    """
    H, D = w1.shape
    C, _ = w2.shape
    H_pad = _round_up(H, 128)
    C_pad = _round_up(C, 128)

    w1_p = jnp.zeros((H_pad, D), w1.dtype).at[:H, :].set(w1)
    b1_p = jnp.zeros((1, H_pad), b1.dtype).at[0, :H].set(b1)
    w2_p = jnp.zeros((C_pad, H_pad), w2.dtype).at[:C, :H].set(w2)
    b2_p = jnp.zeros((1, C_pad), b2.dtype).at[0, :C].set(b2)
    return w1_p, b1_p, w2_p, b2_p, C


@functools.partial(jax.jit, static_argnames=("num_classes", "tile_b"))
def mlp_forward(x, w1_p, b1_p, w2_p, b2_p, *, num_classes, tile_b=512):
    """x: [B, D] f32; padded params from prepare_params(). Returns [B, num_classes]."""
    B, D = x.shape
    H_pad = w1_p.shape[0]
    C_pad = w2_p.shape[0]

    # Batch tile: multiple of 8 sublanes, capped at tile_b rows.
    TB = min(tile_b, _round_up(B, 8))
    B_pad = _round_up(B, TB)
    if B_pad != B:
        x_in = jnp.zeros((B_pad, D), x.dtype).at[:B, :].set(x)
    else:
        x_in = x

    grid = (B_pad // TB,)

    flops = 2 * B_pad * (D * H_pad + H_pad * C_pad)
    bytes_accessed = 4 * (
        B_pad * D + H_pad * D + H_pad + C_pad * H_pad + C_pad + B_pad * C_pad
    )

    out = pl.pallas_call(
        mlp_kernel,
        out_shape=jax.ShapeDtypeStruct((B_pad, C_pad), x.dtype),
        grid_spec=pltpu.PrefetchScalarGridSpec(
            num_scalar_prefetch=0,
            grid=grid,
            in_specs=[
                pl.BlockSpec((TB, D), lambda i: (i, 0)),       # x: streamed / double-buffered
                pl.BlockSpec((H_pad, D), lambda i: (0, 0)),    # w1: VMEM-resident
                pl.BlockSpec((1, H_pad), lambda i: (0, 0)),    # b1: VMEM-resident
                pl.BlockSpec((C_pad, H_pad), lambda i: (0, 0)),# w2: VMEM-resident
                pl.BlockSpec((1, C_pad), lambda i: (0, 0)),    # b2: VMEM-resident
            ],
            out_specs=pl.BlockSpec((TB, C_pad), lambda i: (i, 0)),  # lane-dense output block
        ),
        compiler_params=pltpu.CompilerParams(
            dimension_semantics=("parallel",),                 # shards batch across TCs on v7x
        ),
        cost_estimate=pl.CostEstimate(
            flops=flops, transcendentals=0, bytes_accessed=bytes_accessed
        ),
    )(x_in, w1_p, b1_p, w2_p, b2_p)

    # Strip batch and class padding (glue, not hot path).
    return out[:B, :num_classes]


if __name__ == "__main__":
    # Small shapes consistent with Model(input_size, hidden_size, num_classes)
    batch, input_size, hidden_size, num_classes = 8, 64, 32, 16

    key = jax.random.PRNGKey(0)
    kx, k1, kb1, k2, kb2 = jax.random.split(key, 5)

    x = jax.random.normal(kx, (batch, input_size), dtype=jnp.float32)

    # PyTorch nn.Linear layout: weight [out, in], bias [out].
    bound1 = 1.0 / jnp.sqrt(input_size)
    w1 = jax.random.uniform(k1, (hidden_size, input_size),
                            minval=-bound1, maxval=bound1, dtype=jnp.float32)
    b1 = jax.random.uniform(kb1, (hidden_size,),
                            minval=-bound1, maxval=bound1, dtype=jnp.float32)
    bound2 = 1.0 / jnp.sqrt(hidden_size)
    w2 = jax.random.uniform(k2, (num_classes, hidden_size),
                            minval=-bound2, maxval=bound2, dtype=jnp.float32)
    b2 = jax.random.uniform(kb2, (num_classes,),
                            minval=-bound2, maxval=bound2, dtype=jnp.float32)

    # One-time parameter prep (padding to lane-dense H/C), then run the kernel.
    w1_p, b1_p, w2_p, b2_p, _ = prepare_params(w1, b1, w2, b2)
    out = mlp_forward(x, w1_p, b1_p, w2_p, b2_p, num_classes=num_classes)
    jax.block_until_ready(out)

    # Pure-JAX reference check
    ref = jnp.maximum(x @ w1.T + b1, 0.0) @ w2.T + b2
    assert out.shape == (batch, num_classes)
    assert jnp.allclose(out, ref, atol=1e-5, rtol=1e-5)

    print("KERNEL_OK")
</pallas_src>

<mosaic_0001>
module attributes {stable_mosaic.version = 11 : i64} {
  func.func @mlp_kernel(%arg0: i32, %arg1: memref<8x64xf32, #tpu.memory_space<vmem>>, %arg2: memref<128x64xf32, #tpu.memory_space<vmem>>, %arg3: memref<1x128xf32, #tpu.memory_space<vmem>>, %arg4: memref<128x128xf32, #tpu.memory_space<vmem>>, %arg5: memref<1x128xf32, #tpu.memory_space<vmem>>, %arg6: memref<8x128xf32, #tpu.memory_space<vmem>>) attributes {dimension_semantics = [#tpu.dimension_semantics<parallel>], iteration_bounds = array<i64: 1>, scalar_prefetch = 0 : i64, scratch_operands = 0 : i64, tpu.core_type = #tpu.core_type<tc>, window_params = [{transform_indices = @transform_0, window_bounds = array<i64: 8, 64>}, {pipeline_mode = #tpu.pipeline_mode<synchronous>, transform_indices = @transform_1, window_bounds = array<i64: 128, 64>}, {pipeline_mode = #tpu.pipeline_mode<synchronous>, transform_indices = @transform_2, window_bounds = array<i64: 1, 128>}, {pipeline_mode = #tpu.pipeline_mode<synchronous>, transform_indices = @transform_3, window_bounds = array<i64: 128, 128>}, {pipeline_mode = #tpu.pipeline_mode<synchronous>, transform_indices = @transform_4, window_bounds = array<i64: 1, 128>}, {transform_indices = @transform_5, window_bounds = array<i64: 8, 128>}]} {
    %c0 = arith.constant 0 : index
    %c0_0 = arith.constant 0 : index
    %0 = vector.load %arg1[%c0, %c0_0] : memref<8x64xf32, #tpu.memory_space<vmem>>, vector<8x64xf32>
    %c0_1 = arith.constant 0 : index
    %c0_2 = arith.constant 0 : index
    %1 = vector.load %arg2[%c0_1, %c0_2] : memref<128x64xf32, #tpu.memory_space<vmem>>, vector<128x64xf32>
    %cst = arith.constant dense<0.000000e+00> : vector<8x128xf32>
    %2 = tpu.matmul %0, %1, %cst {dimension_numbers = #tpu.dot_dimension_numbers<[1], [1], [0], [0], [0, 0, 1, 0], [], []>} : vector<8x64xf32>, vector<128x64xf32>, vector<8x128xf32> -> vector<8x128xf32>
    %c0_3 = arith.constant 0 : index
    %c0_4 = arith.constant 0 : index
    %3 = vector.load %arg3[%c0_3, %c0_4] : memref<1x128xf32, #tpu.memory_space<vmem>>, vector<1x128xf32>
    %4 = vector.broadcast %3 : vector<1x128xf32> to vector<8x128xf32>
    %5 = arith.addf %2, %4 : vector<8x128xf32>
    %cst_5 = arith.constant 0.000000e+00 : f32
    %6 = vector.broadcast %cst_5 : f32 to vector<8x128xf32>
    %7 = arith.maximumf %5, %6 : vector<8x128xf32>
    %c0_6 = arith.constant 0 : index
    %c0_7 = arith.constant 0 : index
    %8 = vector.load %arg4[%c0_6, %c0_7] : memref<128x128xf32, #tpu.memory_space<vmem>>, vector<128x128xf32>
    %cst_8 = arith.constant dense<0.000000e+00> : vector<8x128xf32>
    %9 = tpu.matmul %7, %8, %cst_8 {dimension_numbers = #tpu.dot_dimension_numbers<[1], [1], [0], [0], [0, 0, 1, 0], [], []>} : vector<8x128xf32>, vector<128x128xf32>, vector<8x128xf32> -> vector<8x128xf32>
    %c0_9 = arith.constant 0 : index
    %c0_10 = arith.constant 0 : index
    %10 = vector.load %arg5[%c0_9, %c0_10] : memref<1x128xf32, #tpu.memory_space<vmem>>, vector<1x128xf32>
    %11 = vector.broadcast %10 : vector<1x128xf32> to vector<8x128xf32>
    %12 = arith.addf %9, %11 : vector<8x128xf32>
    %c0_11 = arith.constant 0 : index
    %c0_12 = arith.constant 0 : index
    %13 = vector.load %arg6[%c0_11, %c0_12] : memref<8x128xf32, #tpu.memory_space<vmem>>, vector<8x128xf32>
    tpu.vector_store %arg6[%c0_11, %c0_12], %12 {strides = array<i32>} : memref<8x128xf32, #tpu.memory_space<vmem>>, vector<8x128xf32>,
    return
  }
  func.func @transform_0(%arg0: i32) -> (i32, i32) {
    %c0_i32 = arith.constant 0 : i32
    %c0_i32_0 = arith.constant 0 : i32
    return %arg0, %c0_i32 : i32, i32
  }
  func.func @transform_1(%arg0: i32) -> (i32, i32) {
    %c0_i32 = arith.constant 0 : i32
    %c0_i32_0 = arith.constant 0 : i32
    %c0_i32_1 = arith.constant 0 : i32
    return %c0_i32, %c0_i32_0 : i32, i32
  }
  func.func @transform_2(%arg0: i32) -> (i32, i32) {
    %c0_i32 = arith.constant 0 : i32
    %c0_i32_0 = arith.constant 0 : i32
    %c0_i32_1 = arith.constant 0 : i32
    return %c0_i32, %c0_i32_0 : i32, i32
  }
  func.func @transform_3(%arg0: i32) -> (i32, i32) {
    %c0_i32 = arith.constant 0 : i32
    %c0_i32_0 = arith.constant 0 : i32
    %c0_i32_1 = arith.constant 0 : i32
    return %c0_i32, %c0_i32_0 : i32, i32
  }
  func.func @transform_4(%arg0: i32) -> (i32, i32) {
    %c0_i32 = arith.constant 0 : i32
    %c0_i32_0 = arith.constant 0 : i32
    %c0_i32_1 = arith.constant 0 : i32
    return %c0_i32, %c0_i32_0 : i32, i32
  }
  func.func @transform_5(%arg0: i32) -> (i32, i32) {
    %c0_i32 = arith.constant 0 : i32
    %c0_i32_0 = arith.constant 0 : i32
    return %arg0, %c0_i32 : i32, i32
  }
}

</mosaic_0001>

<bundles_post_ra>
// kernel: mlp_forward.1
= control target key start
LH: loop header
LB: loop body
LE: loop exit
PB: predicated region body
PF: predicated region fallthrough
CT: control target
= control target key end

     0   :  { %vm45_vm0 = vcmask 523264   ;;  %v483_v2 = vmov 0.0|0.0   ;;  %vm484_vm2 = vmmov 0   ;;  %v485_v5 = vmov 0.0   ;;  %s673_s0 = inlined_call_operand.vmem [shape: f32[8,64], index: 0, kind: input, shape index: {}]   ;;  %s674_s1 = inlined_call_operand.vmem [shape: f32[128,64], index: 1, kind: input, shape index: {}]   ;;  %s675_s2 = inlined_call_operand.vmem [shape: f32[1,128], index: 2, kind: input, shape index: {}]   ;;  %s676_s3 = inlined_call_operand.vmem [shape: f32[128,128], index: 3, kind: input, shape index: {}]   ;;  %s677_s4 = inlined_call_operand.vmem [shape: f32[1,128], index: 4, kind: input, shape index: {}]   ;;  %s678_s5 = inlined_call_operand.hbm [shape: f32[8,128], index: 5, kind: output, shape index: {}]  }
   0x1   :  { %v22_v0 = vld [vmem:[%s674_s1] sm:$0xff]  ;;  %v23_v1 = vld [vmem:[%s674_s1 + $0x8] sm:$0xff]  ;;  %399 = vmatprep.subr.bf16.mxu0 %v483_v2  ;;  %vm526_vm1 = vmpackc.low %vm45_vm0, %vm45_vm0  ;;  %431 = vmatprep.subr.bf16.mxu1 %v483_v2 }
   0x2   :  { %v400_v3 = vpack.c.bf16 %v23_v1, %v22_v0  ;;  %361 = vmatprep.mubr.msk.f32.mxu0 %vm484_vm2, %v485_v5  ;;  %396 = vmatprep.mubr.msk.f32.mxu1 %vm484_vm2, %v485_v5  ;;  %v24_v6 = vld [vmem:[%s674_s1 + $0x10] sm:$0xff]  ;;  %v25_v7 = vld [vmem:[%s674_s1 + $0x18] sm:$0xff]  ;;  %v168_v8 = vld [vmem:[%s676_s3] sm:$0xff] }
   0x3   :  { %v169_v9 = vld [vmem:[%s676_s3 + $0x8] sm:$0xff]  ;;  %v404_v10 = vpack.c.bf16 %v25_v7, %v24_v6  ;;  %v170_v12 = vld [vmem:[%s676_s3 + $0x10] sm:$0xff]  ;;  %v171_v13 = vld [vmem:[%s676_s3 + $0x18] sm:$0xff] }
   0x4   :  { %402 = vmatpush3.bf16.xpose.msk.msra.mxu0 %vm526_vm1, %v400_v3  ;;  %v432_v11 = vpack.c.bf16 %v169_v9, %v168_v8 }
   0x5   :  { %403 = vmatprep.subr.bf16.mxu0 %v483_v2 }
   0x6   :  { %433 = vmatpush3.bf16.xpose.msra.mxu1 %v432_v11 }
   0x7   :  { %434 = vmatprep.subr.bf16.mxu1 %v483_v2 }
   0xc   :  { %406 = vmatpush3.bf16.xpose.msk.msra.mxu0 %vm526_vm1, %v404_v10 }
   0xd   :  { %10 = vsyncpa [#allocation3], 0  ;;  %407 = vmatprep.subr.bf16.mxu0 %v483_v2  ;;  %v26_v14 = vld [vmem:[%s674_s1 + $0x20] sm:$0xff]  ;;  %v27_v15 = vld [vmem:[%s674_s1 + $0x28] sm:$0xff]  ;;  %v435_v16 = vpack.c.bf16 %v171_v13, %v170_v12  ;;  %s486_s11 = smov [#allocation2]  }
   0xe   :  { %v408_v17 = vpack.c.bf16 %v27_v15, %v26_v14  ;;  %v172_v18 = vld [vmem:[%s676_s3 + $0x20] sm:$0xff]  ;;  %v173_v19 = vld [vmem:[%s676_s3 + $0x28] sm:$0xff]  ;;  %v28_v20 = vld [vmem:[%s674_s1 + $0x30] sm:$0xff]  ;;  %s268_s12 = sshll.u32 %s486_s11, 4  ;;  %s269_s12 = int_to_ptr.vmem [resolvable:$true] %s268_s12 }
   0xf   :  { %436 = vmatpush3.bf16.xpose.msra.mxu1 %v435_v16  ;;  %v29_v21 = vld [vmem:[%s674_s1 + $0x38] sm:$0xff]  ;;  %v438_v22 = vpack.c.bf16 %v173_v19, %v172_v18  ;;  %v174_v24 = vld [vmem:[%s676_s3 + $0x30] sm:$0xff]  ;;  %v30_v26 = vld [vmem:[%s674_s1 + $0x40] sm:$0xff]  ;;  %p464_p1 = scmp.lt.s32.totalorder %s269_s12, %s269_s12 }
  0x10   :  { %437 = vmatprep.subr.bf16.mxu1 %v483_v2  ;;  %v412_v23 = vpack.c.bf16 %v29_v21, %v28_v20  ;;  %v175_v25 = vld [vmem:[%s676_s3 + $0x38] sm:$0xff]  ;;  %v31_v27 = vld [vmem:[%s674_s1 + $0x48] sm:$0xff]  ;;  %v176_v30 = vld [vmem:[%s676_s3 + $0x40] sm:$0xff] }
  0x11   :  { %v441_v28 = vpack.c.bf16 %v175_v25, %v174_v24  ;;  %v416_v29 = vpack.c.bf16 %v31_v27, %v30_v26  ;;  %v177_v31 = vld [vmem:[%s676_s3 + $0x48] sm:$0xff]  ;;  %v32_v32 = vld [vmem:[%s674_s1 + $0x50] sm:$0xff]  ;;  %v33_v33 = vld [vmem:[%s674_s1 + $0x58] sm:$0xff] }
  0x12   :  { %v444_v34 = vpack.c.bf16 %v177_v31, %v176_v30  ;;  %v420_v35 = vpack.c.bf16 %v33_v33, %v32_v32  ;;  %v178_v36 = vld [vmem:[%s676_s3 + $0x50] sm:$0xff]  ;;  %v179_v37 = vld [vmem:[%s676_s3 + $0x58] sm:$0xff]  ;;  %v34_v38 = vld [vmem:[%s674_s1 + $0x60] sm:$0xff] }
  0x13   :  { %v35_v39 = vld [vmem:[%s674_s1 + $0x68] sm:$0xff]  ;;  %v447_v40 = vpack.c.bf16 %v179_v37, %v178_v36  ;;  %v180_v42 = vld [vmem:[%s676_s3 + $0x60] sm:$0xff]  ;;  %v36_v44 = vld [vmem:[%s674_s1 + $0x70] sm:$0xff] }
  0x14   :  { %410 = vmatpush3.bf16.xpose.msk.msra.mxu0 %vm526_vm1, %v408_v17  ;;  %v424_v41 = vpack.c.bf16 %v35_v39, %v34_v38  ;;  %v181_v43 = vld [vmem:[%s676_s3 + $0x68] sm:$0xff]  ;;  %v37_v45 = vld [vmem:[%s674_s1 + $0x78] sm:$0xff]  ;;  %v182_v48 = vld [vmem:[%s676_s3 + $0x70] sm:$0xff] }
  0x15   :  { %411 = vmatprep.subr.bf16.mxu0 %v483_v2  ;;  %v450_v46 = vpack.c.bf16 %v181_v43, %v180_v42  ;;  %v428_v47 = vpack.c.bf16 %v37_v45, %v36_v44  ;;  %v183_v49 = vld [vmem:[%s676_s3 + $0x78] sm:$0xff]  ;;  %v21_v51 = vld [vmem:[%s673_s0] sm:$0xff]  ;;  %s459_s0 = scalar_lea.vmem %s269_s12, 128 }
  0x16   :  { %v453_v50 = vpack.c.bf16 %v183_v49, %v182_v48  ;;  %v276_v52 = vld [vmem:[%s675_s2] ss:$0 sm:$0xff]  ;;  %p460_p0 = scmp.ne.s32.totalorder %s269_s12, %s459_s0  ;;  %p465_p2 = scmp.lt.s32.totalorder %s459_s0, %s459_s0 }
  0x17   :  { %439 = vmatpush3.bf16.xpose.msra.mxu1 %v438_v22  ;;  %v294_v57 = vld [vmem:[%s677_s4] ss:$0 sm:$0xff] }
  0x18   :  { %440 = vmatprep.subr.bf16.mxu1 %v483_v2  ;;  %p466_p3 = por %p465_p2, %p464_p1 }
  0x1a   :  { %p467_p4 = pnand %p466_p3, %p460_p0 }
  0x1c   :  { %414 = vmatpush3.bf16.xpose.msk.msra.mxu0 %vm526_vm1, %v412_v23 }
  0x1d   :  { %415 = vmatprep.subr.bf16.mxu0 %v483_v2 }
  0x1f   :  { %442 = vmatpush3.bf16.xpose.msra.mxu1 %v441_v28 }
  0x20   :  { %443 = vmatprep.subr.bf16.mxu1 %v483_v2 }
  0x24   :  { %418 = vmatpush3.bf16.xpose.msk.msra.mxu0 %vm526_vm1, %v416_v29 }
  0x25   :  { %419 = vmatprep.subr.bf16.mxu0 %v483_v2 }
  0x27   :  { %445 = vmatpush3.bf16.xpose.msra.mxu1 %v444_v34 }
  0x28   :  { %446 = vmatprep.subr.bf16.mxu1 %v483_v2 }
  0x2c   :  { %422 = vmatpush3.bf16.xpose.msk.msra.mxu0 %vm526_vm1, %v420_v35 }
  0x2d   :  { %423 = vmatprep.subr.bf16.mxu0 %v483_v2 }
  0x2f   :  { %448 = vmatpush3.bf16.xpose.msra.mxu1 %v447_v40 }
  0x30   :  { %449 = vmatprep.subr.bf16.mxu1 %v483_v2 }
  0x34   :  { %426 = vmatpush3.bf16.xpose.msk.msra.mxu0 %vm526_vm1, %v424_v41 }
  0x35   :  { %427 = vmatprep.subr.bf16.mxu0 %v483_v2 }
  0x37   :  { %451 = vmatpush3.bf16.xpose.msra.mxu1 %v450_v46 }
  0x38   :  { %452 = vmatprep.subr.bf16.mxu1 %v483_v2 }
  0x3c   :  { %430 = vmatpush3.bf16.xpose.msk.msra.mxu0 %vm526_vm1, %v428_v47 }
  0x3f   :  { %454 = vmatpush3.bf16.xpose.msra.mxu1 %v453_v50 }
  0x43   :  { %362 = vmatmul.mubr.msk.f32.vlgmr.msra.gmra.mrb[0].mxu0 %vm45_vm0, %v21_v51 }
 0x116   :  { %v163_v53 = vpop.f32.mrb[0].mxu0 }
 0x117   :  { %v164_v54 = vadd.f32 %v276_v52, %v163_v53  ;;  %v363_v55 = vpop.f32.mrb[1].mxu0 }
 0x119   :  { %v167_v56 = vmax.f32 %v164_v54, 0.0 }
 0x11b   :  { %397 = vmatmul.mubr.f32.vlgmr.msra.gmra.mrb[0].mxu1 %v167_v56 }
 0x1ee   :  { %v257_v58 = vpop.f32.mrb[0].mxu1 }
 0x1ef   :  { %v258_v59 = vadd.f32 %v294_v57, %v257_v58  ;;  %v398_v60 = vpop.f32.mrb[1].mxu1 }
 0x1f1   :  { %261 = vst [vmem:[#allocation2] sm:$0xff] %v258_v59 }
 0x1f2   :  { %470 = shalt.err (!%p467_p4)
}
 0x1f3   :  { %s471_s14 = scalar_lea.hbm %s678_s5, 128 }
 0x1f4   :  { %p472_p5 = scmp.ne.s32.totalorder %s678_s5, %s471_s14  ;;  %p475_p6 = scmp.lt.u32.totalorder %s471_s14, %s678_s5 }
 0x1f6   :  { %p477_p7 = pnand %p475_p6, %p472_p5 }
 0x1f8   :  { %480 = shalt.err (!%p477_p7)
}
 0x1f9   :  { %271 = dma.vmem_to_hbm [thread:$0]  %s269_s12, 128, %s678_s5, [#allocation3]  }
 0x1fa   :  { %481 = dma.done.wait [#allocation3], 128  }
 0x1fb   :  { %482 = vsyncadd [#allocation3], 4294967168 }
 0x1fc   :  { %275 = vsyncpa [#allocation3], 1 }

</bundles_post_ra>
